<compile_context>
chip_gen: v7x
topology: tpu7x:2x2x1
jax: 0.10.0
libtpu: 0.0.40
codegen_flags: <defaults>
</compile_context>

<pallas_src>
import functools

import jax
import jax.numpy as jnp
from jax import lax
from jax.experimental import pallas as pl
from jax.experimental.pallas import tpu as pltpu

NORM_SHAPE = 64
DROP_P = 0.1
EPS = 1e-5          # PyTorch nn.LayerNorm default
ROW_BLOCK = 1024    # folded (128-lane) rows per grid step == 2048 original rows


def _round_up(x, m):
    return (x + m - 1) // m * m


def _uniform_from_hash(shape, row_off_u32, seed_u32):
    """Stateless per-element hash -> uniform [0, 1). Pure integer VPU ops."""
    r = lax.broadcasted_iota(jnp.int32, shape, 0).astype(jnp.uint32) + row_off_u32
    c = lax.broadcasted_iota(jnp.int32, shape, 1).astype(jnp.uint32)
    x = r * jnp.uint32(0x9E3779B1) + c * jnp.uint32(0x85EBCA77) + seed_u32
    x = (x ^ (x >> 16)) * jnp.uint32(0x7FEB352D)
    x = (x ^ (x >> 15)) * jnp.uint32(0x846CA68B)
    x = x ^ (x >> 16)
    # top 24 bits -> float in [0, 1)
    return (x >> 8).astype(jnp.float32) * (1.0 / (1 << 24))


def _addnorm_kernel(seed_ref, orig_ref, res_ref, gamma_ref, beta_ref, out_ref,
                    *, drop_p, training, d, row_block):
    d2 = 2 * d
    res = res_ref[...].astype(jnp.float32)     # (row_block, 2*d), lane-dense
    orig = orig_ref[...].astype(jnp.float32)

    if training and drop_p > 0.0:
        # Inverted dropout (matches torch.nn.Dropout scaling).  Mask values
        # come from a different RNG stream than PyTorch, semantics match.
        seed_u = seed_ref[0].astype(jnp.uint32)
        row_off = (pl.program_id(0) * row_block).astype(jnp.uint32)
        u = _uniform_from_hash(res.shape, row_off, seed_u)
        keep = (u >= drop_p).astype(jnp.float32) * (1.0 / (1.0 - drop_p))
        res = res * keep

    y = res + orig

    # Two original D-wide rows live in each 128-lane row.  Compute the
    # per-64-lane-segment mean / (biased) variance and re-broadcast.
    lane = lax.broadcasted_iota(jnp.int32, (1, d2), 1)
    is_lo = lane < d
    inv_d = 1.0 / d

    sum_lo = jnp.sum(jnp.where(is_lo, y, 0.0), axis=-1, keepdims=True)
    sum_hi = jnp.sum(jnp.where(is_lo, 0.0, y), axis=-1, keepdims=True)
    mean = jnp.where(is_lo, sum_lo, sum_hi) * inv_d

    centered = y - mean
    sq = centered * centered
    var_lo = jnp.sum(jnp.where(is_lo, sq, 0.0), axis=-1, keepdims=True)
    var_hi = jnp.sum(jnp.where(is_lo, 0.0, sq), axis=-1, keepdims=True)
    var = jnp.where(is_lo, var_lo, var_hi) * inv_d

    inv = lax.rsqrt(var + EPS)                              # EUP
    scale = gamma_ref[...].astype(jnp.float32) * inv        # fuse gamma * inv
    out_ref[...] = (centered * scale
                    + beta_ref[...].astype(jnp.float32)).astype(out_ref.dtype)


def add_norm(original, res, gamma, beta, *, drop_p=DROP_P, training=False, seed=0):
    assert original.shape == res.shape
    d = original.shape[-1]
    assert gamma.shape == (d,) and beta.shape == (d,)
    d2 = 2 * d

    orig2d = original.reshape(-1, d)
    res2d = res.reshape(-1, d)
    n = orig2d.shape[0]

    # Fold two D-wide rows into one 128-lane-dense row; pad so the tiled
    # fast path is unconditional (no whole-array fallback tile).
    rows = (n + 1) // 2
    blk = min(ROW_BLOCK, _round_up(rows, 8))
    rows_p = _round_up(rows, blk)
    n_p = 2 * rows_p
    if n_p != n:
        pad = ((0, n_p - n), (0, 0))
        orig2d = jnp.pad(orig2d, pad)
        res2d = jnp.pad(res2d, pad)
    orig_f = orig2d.reshape(rows_p, d2)
    res_f = res2d.reshape(rows_p, d2)

    gamma2 = jnp.concatenate([gamma, gamma]).reshape(1, d2)
    beta2 = jnp.concatenate([beta, beta]).reshape(1, d2)
    seed_arr = jnp.asarray([seed], dtype=jnp.int32)   # SMEM scalar prefetch

    kernel = functools.partial(_addnorm_kernel, drop_p=float(drop_p),
                               training=bool(training), d=d, row_block=blk)

    grid = (rows_p // blk,)
    itemsize = jnp.dtype(original.dtype).itemsize
    cost = pl.CostEstimate(flops=10 * n_p * d,
                           transcendentals=n_p,
                           bytes_accessed=3 * n_p * d * itemsize)

    out_f = pl.pallas_call(
        kernel,
        out_shape=jax.ShapeDtypeStruct((rows_p, d2), original.dtype),
        grid_spec=pltpu.PrefetchScalarGridSpec(
            num_scalar_prefetch=1,
            grid=grid,
            in_specs=[
                pl.BlockSpec((blk, d2), lambda i, seed: (i, 0)),   # original
                pl.BlockSpec((blk, d2), lambda i, seed: (i, 0)),   # res
                pl.BlockSpec((1, d2), lambda i, seed: (0, 0)),     # gamma (x2)
                pl.BlockSpec((1, d2), lambda i, seed: (0, 0)),     # beta  (x2)
            ],
            out_specs=pl.BlockSpec((blk, d2), lambda i, seed: (i, 0)),
        ),
        compiler_params=pltpu.CompilerParams(
            dimension_semantics=("parallel",)),
        cost_estimate=cost,
    )(seed_arr, orig_f, res_f, gamma2, beta2)

    out = out_f.reshape(n_p, d)[:n]
    return out.reshape(original.shape)


def _layernorm_ref(original, res, gamma, beta):
    y = res + original
    mean = jnp.mean(y, axis=-1, keepdims=True)
    var = jnp.mean((y - mean) ** 2, axis=-1, keepdims=True)
    return (y - mean) / jnp.sqrt(var + EPS) * gamma + beta


if __name__ == "__main__":
    key = jax.random.PRNGKey(0)
    k1, k2, k3, k4 = jax.random.split(key, 4)

    # Small shapes consistent with the module (norm_shape = 64).
    B, S, D = 2, 8, NORM_SHAPE
    original = jax.random.normal(k1, (B, S, D), dtype=jnp.float32)
    res = jax.random.normal(k2, (B, S, D), dtype=jnp.float32)

    # nn.LayerNorm(norm_shape) init: weight = ones, bias = zeros.
    gamma = jnp.ones((D,), dtype=jnp.float32)
    beta = jnp.zeros((D,), dtype=jnp.float32)

    # Eval-mode forward (dropout is identity), matching module.eval().
    out = jax.block_until_ready(add_norm(original, res, gamma, beta, training=False))
    ref = _layernorm_ref(original, res, gamma, beta)
    assert jnp.allclose(out, ref, atol=1e-5, rtol=1e-5), "eval-mode mismatch"

    # Odd row count exercises the tail-padding / row-folding path.
    o2 = jax.random.normal(k3, (3, 5, D), dtype=jnp.float32)
    r2 = jax.random.normal(k4, (3, 5, D), dtype=jnp.float32)
    out2 = jax.block_until_ready(add_norm(o2, r2, gamma, beta, training=False))
    ref2 = _layernorm_ref(o2, r2, gamma, beta)
    assert jnp.allclose(out2, ref2, atol=1e-5, rtol=1e-5), "padded-path mismatch"

    # Train-mode path (in-kernel stateless-hash dropout); RNG-dependent values.
    out_train = jax.block_until_ready(
        add_norm(original, res, gamma, beta, training=True, seed=123))
    assert out_train.shape == original.shape
    assert bool(jnp.all(jnp.isfinite(out_train))), "train-mode produced non-finite"

    print("KERNEL_OK")
</pallas_src>

<mosaic_0001>
module attributes {stable_mosaic.version = 11 : i64} {
  func.func @_addnorm_kernel(%arg0: i32, %arg1: memref<1xi32, #tpu.memory_space<smem>>, %arg2: memref<8x128xf32, #tpu.memory_space<vmem>>, %arg3: memref<8x128xf32, #tpu.memory_space<vmem>>, %arg4: memref<1x128xf32, #tpu.memory_space<vmem>>, %arg5: memref<1x128xf32, #tpu.memory_space<vmem>>, %arg6: memref<8x128xf32, #tpu.memory_space<vmem>>) attributes {dimension_semantics = [#tpu.dimension_semantics<parallel>], iteration_bounds = array<i64: 1>, scalar_prefetch = 1 : i64, scratch_operands = 0 : i64, tpu.core_type = #tpu.core_type<tc>, window_params = [{transform_indices = @transform_0, window_bounds = array<i64: 8, 128>}, {transform_indices = @transform_1, window_bounds = array<i64: 8, 128>}, {pipeline_mode = #tpu.pipeline_mode<synchronous>, transform_indices = @transform_2, window_bounds = array<i64: 1, 128>}, {pipeline_mode = #tpu.pipeline_mode<synchronous>, transform_indices = @transform_3, window_bounds = array<i64: 1, 128>}, {transform_indices = @transform_4, window_bounds = array<i64: 8, 128>}]} {
    %c0 = arith.constant 0 : index
    %c0_0 = arith.constant 0 : index
    %0 = vector.load %arg3[%c0, %c0_0] : memref<8x128xf32, #tpu.memory_space<vmem>>, vector<8x128xf32>
    %c0_1 = arith.constant 0 : index
    %c0_2 = arith.constant 0 : index
    %1 = vector.load %arg2[%c0_1, %c0_2] : memref<8x128xf32, #tpu.memory_space<vmem>>, vector<8x128xf32>
    %2 = arith.addf %0, %1 : vector<8x128xf32>
    %3 = tpu.iota {dimensions = array<i32: 1>} : vector<1x128xi32>
    %c64_i32 = arith.constant 64 : i32
    %4 = vector.broadcast %c64_i32 : i32 to vector<1x128xi32>
    %5 = arith.cmpi slt, %3, %4 : vector<1x128xi32>
    %cst = arith.constant 0.000000e+00 : f32
    %6 = vector.shape_cast %5 : vector<1x128xi1> to vector<1x128xi1>
    %7 = vector.broadcast %6 : vector<1x128xi1> to vector<8x128xi1>
    %8 = vector.broadcast %cst : f32 to vector<8x128xf32>
    %9 = arith.select %7, %2, %8 : vector<8x128xi1>, vector<8x128xf32>
    %cst_3 = arith.constant dense<0.000000e+00> : vector<8xf32>
    %10 = vector.multi_reduction <add>, %9, %cst_3 [1] : vector<8x128xf32> to vector<8xf32>
    %11 = vector.shape_cast %10 : vector<8xf32> to vector<8x1xf32>
    %cst_4 = arith.constant 0.000000e+00 : f32
    %12 = vector.shape_cast %5 : vector<1x128xi1> to vector<1x128xi1>
    %13 = vector.broadcast %12 : vector<1x128xi1> to vector<8x128xi1>
    %14 = vector.broadcast %cst_4 : f32 to vector<8x128xf32>
    %15 = arith.select %13, %14, %2 : vector<8x128xi1>, vector<8x128xf32>
    %cst_5 = arith.constant dense<0.000000e+00> : vector<8xf32>
    %16 = vector.multi_reduction <add>, %15, %cst_5 [1] : vector<8x128xf32> to vector<8xf32>
    %17 = vector.shape_cast %16 : vector<8xf32> to vector<8x1xf32>
    %18 = vector.shape_cast %5 : vector<1x128xi1> to vector<1x128xi1>
    %19 = vector.broadcast %18 : vector<1x128xi1> to vector<8x128xi1>
    %20 = vector.shape_cast %11 : vector<8x1xf32> to vector<8x1xf32>
    %21 = vector.broadcast %20 : vector<8x1xf32> to vector<8x128xf32>
    %22 = vector.shape_cast %17 : vector<8x1xf32> to vector<8x1xf32>
    %23 = vector.broadcast %22 : vector<8x1xf32> to vector<8x128xf32>
    %24 = arith.select %19, %21, %23 : vector<8x128xi1>, vector<8x128xf32>
    %cst_6 = arith.constant 1.562500e-02 : f32
    %25 = vector.broadcast %cst_6 : f32 to vector<8x128xf32>
    %26 = arith.mulf %24, %25 : vector<8x128xf32>
    %27 = arith.subf %2, %26 : vector<8x128xf32>
    %28 = arith.mulf %27, %27 : vector<8x128xf32>
    %cst_7 = arith.constant 0.000000e+00 : f32
    %29 = vector.shape_cast %5 : vector<1x128xi1> to vector<1x128xi1>
    %30 = vector.broadcast %29 : vector<1x128xi1> to vector<8x128xi1>
    %31 = vector.broadcast %cst_7 : f32 to vector<8x128xf32>
    %32 = arith.select %30, %28, %31 : vector<8x128xi1>, vector<8x128xf32>
    %cst_8 = arith.constant dense<0.000000e+00> : vector<8xf32>
    %33 = vector.multi_reduction <add>, %32, %cst_8 [1] : vector<8x128xf32> to vector<8xf32>
    %34 = vector.shape_cast %33 : vector<8xf32> to vector<8x1xf32>
    %cst_9 = arith.constant 0.000000e+00 : f32
    %35 = vector.shape_cast %5 : vector<1x128xi1> to vector<1x128xi1>
    %36 = vector.broadcast %35 : vector<1x128xi1> to vector<8x128xi1>
    %37 = vector.broadcast %cst_9 : f32 to vector<8x128xf32>
    %38 = arith.select %36, %37, %28 : vector<8x128xi1>, vector<8x128xf32>
    %cst_10 = arith.constant dense<0.000000e+00> : vector<8xf32>
    %39 = vector.multi_reduction <add>, %38, %cst_10 [1] : vector<8x128xf32> to vector<8xf32>
    %40 = vector.shape_cast %39 : vector<8xf32> to vector<8x1xf32>
    %41 = vector.shape_cast %5 : vector<1x128xi1> to vector<1x128xi1>
    %42 = vector.broadcast %41 : vector<1x128xi1> to vector<8x128xi1>
    %43 = vector.shape_cast %34 : vector<8x1xf32> to vector<8x1xf32>
    %44 = vector.broadcast %43 : vector<8x1xf32> to vector<8x128xf32>
    %45 = vector.shape_cast %40 : vector<8x1xf32> to vector<8x1xf32>
    %46 = vector.broadcast %45 : vector<8x1xf32> to vector<8x128xf32>
    %47 = arith.select %42, %44, %46 : vector<8x128xi1>, vector<8x128xf32>
    %cst_11 = arith.constant 1.562500e-02 : f32
    %48 = vector.broadcast %cst_11 : f32 to vector<8x128xf32>
    %49 = arith.mulf %47, %48 : vector<8x128xf32>
    %cst_12 = arith.constant 9.99999974E-6 : f32
    %50 = vector.broadcast %cst_12 : f32 to vector<8x128xf32>
    %51 = arith.addf %49, %50 : vector<8x128xf32>
    %52 = math.rsqrt %51 : vector<8x128xf32>
    %c0_13 = arith.constant 0 : index
    %c0_14 = arith.constant 0 : index
    %53 = vector.load %arg4[%c0_13, %c0_14] : memref<1x128xf32, #tpu.memory_space<vmem>>, vector<1x128xf32>
    %54 = vector.broadcast %53 : vector<1x128xf32> to vector<8x128xf32>
    %55 = arith.mulf %54, %52 : vector<8x128xf32>
    %56 = arith.mulf %27, %55 : vector<8x128xf32>
    %c0_15 = arith.constant 0 : index
    %c0_16 = arith.constant 0 : index
    %57 = vector.load %arg5[%c0_15, %c0_16] : memref<1x128xf32, #tpu.memory_space<vmem>>, vector<1x128xf32>
    %58 = vector.broadcast %57 : vector<1x128xf32> to vector<8x128xf32>
    %59 = arith.addf %56, %58 : vector<8x128xf32>
    %c0_17 = arith.constant 0 : index
    %c0_18 = arith.constant 0 : index
    %60 = vector.load %arg6[%c0_17, %c0_18] : memref<8x128xf32, #tpu.memory_space<vmem>>, vector<8x128xf32>
    tpu.vector_store %arg6[%c0_17, %c0_18], %59 {strides = array<i32>} : memref<8x128xf32, #tpu.memory_space<vmem>>, vector<8x128xf32>,
    return
  }
  func.func @transform_0(%arg0: i32, %arg1: memref<1xi32, #tpu.memory_space<smem>>) -> (i32, i32) {
    %c0_i32 = arith.constant 0 : i32
    %c0_i32_0 = arith.constant 0 : i32
    return %arg0, %c0_i32 : i32, i32
  }
  func.func @transform_1(%arg0: i32, %arg1: memref<1xi32, #tpu.memory_space<smem>>) -> (i32, i32) {
    %c0_i32 = arith.constant 0 : i32
    %c0_i32_0 = arith.constant 0 : i32
    return %arg0, %c0_i32 : i32, i32
  }
  func.func @transform_2(%arg0: i32, %arg1: memref<1xi32, #tpu.memory_space<smem>>) -> (i32, i32) {
    %c0_i32 = arith.constant 0 : i32
    %c0_i32_0 = arith.constant 0 : i32
    %c0_i32_1 = arith.constant 0 : i32
    return %c0_i32, %c0_i32_0 : i32, i32
  }
  func.func @transform_3(%arg0: i32, %arg1: memref<1xi32, #tpu.memory_space<smem>>) -> (i32, i32) {
    %c0_i32 = arith.constant 0 : i32
    %c0_i32_0 = arith.constant 0 : i32
    %c0_i32_1 = arith.constant 0 : i32
    return %c0_i32, %c0_i32_0 : i32, i32
  }
  func.func @transform_4(%arg0: i32, %arg1: memref<1xi32, #tpu.memory_space<smem>>) -> (i32, i32) {
    %c0_i32 = arith.constant 0 : i32
    %c0_i32_0 = arith.constant 0 : i32
    return %arg0, %c0_i32 : i32, i32
  }
}

</mosaic_0001>

<bundles_post_ra>
// kernel: tpu_custom_call.1
= control target key start
LH: loop header
LB: loop body
LE: loop exit
PB: predicated region body
PF: predicated region fallthrough
CT: control target
= control target key end

     0   :  { %11 = vsyncpa [#allocation5], 0  ;;  %s266_s0 = inlined_call_operand.<no memory space> [shape: s32[1], index: 0, kind: input, shape index: {}]   ;;  %s267_s1 = inlined_call_operand.hbm [shape: f32[8,128], index: 1, kind: input, shape index: {}]   ;;  %s268_s2 = inlined_call_operand.hbm [shape: f32[8,128], index: 2, kind: input, shape index: {}]   ;;  %s269_s3 = inlined_call_operand.vmem [shape: f32[1,128], index: 3, kind: input, shape index: {}]   ;;  %s270_s4 = inlined_call_operand.vmem [shape: f32[1,128], index: 4, kind: input, shape index: {}]   ;;  %s271_s5 = inlined_call_operand.hbm [shape: f32[8,128], index: 5, kind: output, shape index: {}]  }
   0x1   :  { %12 = vsyncpa [#allocation8], 0 }
   0x2   :  { %13 = vsyncpa [#allocation6], 0  ;;  %s185_s18 = smov [#allocation4]   ;;  %s186_s19 = smov [#allocation7]  }
   0x3   :  { %s20_s0 = sshll.u32 %s185_s18, 4  ;;  %s30_s20 = sshll.u32 %s186_s19, 4  ;;  %s21_s0 = int_to_ptr.vmem [resolvable:$true] %s20_s0  ;;  %s31_s20 = int_to_ptr.vmem [resolvable:$true] %s30_s20 }
   0x4   :  { %s113_s23 = scalar_lea.hbm %s267_s1, 128 }
   0x5   :  { %p114_p0 = scmp.ne.s32.totalorder %s267_s1, %s113_s23  ;;  %p117_p1 = scmp.lt.u32.totalorder %s113_s23, %s267_s1 }
   0x7   :  { %p119_p2 = pnand %p117_p1, %p114_p0 }
   0x9   :  { %122 = shalt.err (!%p119_p2)
}
   0xa   :  { %s123_s28 = scalar_lea.vmem %s21_s0, 128  ;;  %p128_p4 = scmp.lt.s32.totalorder %s21_s0, %s21_s0 }
   0xb   :  { %p124_p3 = scmp.ne.s32.totalorder %s21_s0, %s123_s28  ;;  %p129_p5 = scmp.lt.s32.totalorder %s123_s28, %s123_s28 }
   0xd   :  { %p130_p6 = por %p129_p5, %p128_p4 }
   0xf   :  { %p131_p7 = pnand %p130_p6, %p124_p3 }
  0x11   :  { %134 = shalt.err (!%p131_p7)
}
  0x12   :  { %23 = dma.hbm_to_vmem [thread:$0]  %s267_s1, 128, %s21_s0, [#allocation5]  }
  0x13   :  { %s135_s8 = scalar_lea.hbm %s268_s2, 128 }
  0x14   :  { %p136_p8 = scmp.ne.s32.totalorder %s268_s2, %s135_s8  ;;  %p139_p9 = scmp.lt.u32.totalorder %s135_s8, %s268_s2 }
  0x16   :  { %p141_p10 = pnand %p139_p9, %p136_p8 }
  0x18   :  { %144 = shalt.err (!%p141_p10)
}
  0x19   :  { %s145_s13 = scalar_lea.vmem %s31_s20, 128  ;;  %p150_p12 = scmp.lt.s32.totalorder %s31_s20, %s31_s20 }
  0x1a   :  { %p146_p11 = scmp.ne.s32.totalorder %s31_s20, %s145_s13  ;;  %p151_p13 = scmp.lt.s32.totalorder %s145_s13, %s145_s13 }
  0x1c   :  { %p152_p0 = por %p151_p13, %p150_p12 }
  0x1e   :  { %p153_p1 = pnand %p152_p0, %p146_p11 }
  0x20   :  { %156 = shalt.err (!%p153_p1)
}
  0x21   :  { %33 = dma.hbm_to_vmem [thread:$0]  %s268_s2, 128, %s31_s20, [#allocation8]  }
  0x22   :  { %179 = dma.done.wait [#allocation5], 128  }
  0x23   :  { %180 = vsyncadd [#allocation5], 4294967168 }
  0x24   :  { %181 = dma.done.wait [#allocation8], 128  }
  0x25   :  { %182 = vsyncadd [#allocation8], 4294967168  ;;  %v47_v0 = vlaneseq  ;;  %v44_v2 = vld [vmem:[#allocation7] sm:$0xff]  ;;  %v45_v3 = vld [vmem:[#allocation4] sm:$0xff]  ;;  %s187_s18 = smov [#allocation9]  }
  0x26   :  { %v46_v4 = vadd.f32 %v45_v3, %v44_v2  ;;  %v106_v20 = vld [vmem:[%s269_s3] ss:$0 sm:$0xff]  ;;  %s96_s0 = sshll.u32 %s187_s18, 4  ;;  %s97_s0 = int_to_ptr.vmem [resolvable:$true] %s96_s0 }
  0x27   :  { %v48_v1 = vand.u32 127, %v47_v0  ;;  %v107_v23 = vld [vmem:[%s270_s4] ss:$0 sm:$0xff]  ;;  %s157_s19 = scalar_lea.vmem %s97_s0, 128  ;;  %p162_p3 = scmp.lt.s32.totalorder %s97_s0, %s97_s0 }
  0x28   :  { %p158_p2 = scmp.ne.s32.totalorder %s97_s0, %s157_s19  ;;  %p163_p4 = scmp.lt.s32.totalorder %s157_s19, %s157_s19 }
  0x29   :  { %vm49_vm0 = vcmp.lt.s32.totalorder %v48_v1, 64 }
  0x2a   :  { %v52_v5 = vsel %vm49_vm0, %v46_v4, 0.0  ;;  %v55_v6 = vsel %vm49_vm0, 0.0, %v46_v4  ;;  %p164_p5 = por %p163_p4, %p162_p3 }
  0x2b   :  { %53 = vadd.xlane.f32.xlu0 %v52_v5 }
  0x2c   :  { %p165_p6 = pnand %p164_p5, %p158_p2 }
  0x2f   :  { %56 = vadd.xlane.f32.xlu0 %v55_v6 }
  0xb8   :  { %v54_v7 = vpop.xlane.xlu0 %53 }
  0xbc   :  { %v57_v8 = vpop.xlane.xlu0 %56 }
  0xbd   :  { %v58_v9 = vsel %vm49_vm0, %v54_v7, %v57_v8 }
  0xbe   :  { %v59_v10 = vmul.f32 0.015625, %v58_v9 }
  0xc0   :  { %v60_v11 = vsub.f32 %v46_v4, %v59_v10 }
  0xc2   :  { %v61_v12 = vmul.f32 %v60_v11, %v60_v11 }
  0xc4   :  { %v62_v13 = vsel %vm49_vm0, %v61_v12, 0.0  ;;  %v65_v14 = vsel %vm49_vm0, 0.0, %v61_v12 }
  0xc5   :  { %63 = vadd.xlane.f32.xlu1 %v62_v13 }
  0xc9   :  { %66 = vadd.xlane.f32.xlu1 %v65_v14 }
 0x152   :  { %v64_v15 = vpop.xlane.xlu1 %63 }
 0x156   :  { %v67_v16 = vpop.xlane.xlu1 %66 }
 0x157   :  { %v68_v17 = vsel %vm49_vm0, %v64_v15, %v67_v16 }
 0x158   :  { %v69_v18 = vmul.f32 0.015625, %v68_v17 }
 0x15a   :  { %v70_v19 = vadd.f32 1e-05, %v69_v18 }
 0x15c   :  { %111 = vrsqrt.f32 %v70_v19 }
 0x166   :  { %v112_v21 = vpop.eup %111 }
 0x167   :  { %v79_v22 = vmul.f32 %v112_v21, %v106_v20 }
 0x169   :  { %v80_v24 = vmul.f32 %v79_v22, %v60_v11 }
 0x16b   :  { %v88_v25 = vadd.f32 %v107_v23, %v80_v24 }
 0x16d   :  { %89 = vst [vmem:[#allocation9] sm:$0xff] %v88_v25 }
 0x16e   :  { %168 = shalt.err (!%p165_p6)
}
 0x16f   :  { %s169_s21 = scalar_lea.hbm %s271_s5, 128 }
 0x170   :  { %p170_p7 = scmp.ne.s32.totalorder %s271_s5, %s169_s21  ;;  %p173_p8 = scmp.lt.u32.totalorder %s169_s21, %s271_s5 }
 0x172   :  { %p175_p9 = pnand %p173_p8, %p170_p7 }
 0x174   :  { %178 = shalt.err (!%p175_p9)
}
 0x175   :  { %99 = dma.vmem_to_hbm [thread:$0]  %s97_s0, 128, %s271_s5, [#allocation6]  }
 0x176   :  { %183 = dma.done.wait [#allocation6], 128  }
 0x177   :  { %184 = vsyncadd [#allocation6], 4294967168 }
 0x178   :  { %103 = vsyncpa [#allocation5], 1 }
 0x179   :  { %104 = vsyncpa [#allocation8], 1 }
 0x17a   :  { %105 = vsyncpa [#allocation6], 1 }

</bundles_post_ra>
